<compile_context>
chip_gen: v6e
topology: v6e:2x2x1
jax: 0.10.0
libtpu: 0.0.40
codegen_flags: <defaults>
</compile_context>

<pallas_src>
import functools

import jax
import jax.numpy as jnp
from jax.experimental import pallas as pl
from jax.experimental.pallas import tpu as pltpu

_LANE = 128                      # TPU lane width (last block dim granularity)
_BLOCK_BYTE_BUDGET = 4 << 20     # 4 MiB per (sublane-padded) block
_VMEM_LIMIT_BYTES = 32 << 20     # safe on v5e/v6e/v7x


def _round_up(x, m):
    return ((x + m - 1) // m) * m


def _crosstalk_kernel(strength_ref, x_ref, o_ref, *, batch):
    """out = x + strength * roll(x, +1, axis=0), on one (B, tile_cols) slab."""
    x = x_ref[...]
    s = strength_ref[0].astype(x.dtype)          # scalar-path read (SMEM)
    if batch == 1:
        rolled = x                                # roll of a single image is itself
    else:
        # Matches torch.cat((x[-1:], x[:-1])): a sublane re-index of the
        # resident slab (XLU/relayout work only -- no extra HBM traffic).
        rolled = jnp.concatenate([x[batch - 1:, :], x[:batch - 1, :]], axis=0)
    o_ref[...] = (x + rolled * s).astype(o_ref.dtype)


def cross_talk(image_batch, strength=0.2, training=True, *,
               xla_fallback_bytes=1 << 20):
    """Pallas implementation of CrossTalk.forward (NCHW input).

    `training` must be a static Python bool.  `strength` may be a Python float
    (enables the zero short-circuit) or a JAX scalar (rides in SMEM, no
    recompile per value).
    """
    if not training:
        return image_batch

    concrete_strength = None
    if isinstance(strength, (int, float)):
        concrete_strength = float(strength)
    if concrete_strength == 0.0:
        return image_batch

    B, C, H, W = image_batch.shape
    dtype = image_batch.dtype
    itemsize = jnp.dtype(dtype).itemsize
    n = C * H * W

    # Small tensors: launch + per-step overhead dominate; fused XLA is faster.
    if B * n * itemsize < xla_fallback_bytes:
        return image_batch + jnp.roll(image_batch, 1, axis=0) * jnp.asarray(
            strength, dtype)

    # ---- lane-dense flattening: (B, C, H, W) -> (B, n), a free reshape -----
    x2d = image_batch.reshape(B, n)

    # Sublane packing per dtype (f32 -> 8, bf16 -> 16, int8/fp8 -> 32); the B
    # rows of each block physically occupy round_up(B, sublane) sublanes.
    packing = max(1, 4 // itemsize)
    sublane = 8 * packing
    rows_padded = _round_up(B, sublane)

    if n <= _LANE:
        # Tiny pixel count: single full-dim block (escape hatch, no 128 rule).
        tile_cols, n_tiles = n, 1
    else:
        total_units = pl.cdiv(n, _LANE)                      # 128-col chunks
        max_units = max(1, _BLOCK_BYTE_BUDGET // (rows_padded * _LANE * itemsize))
        n_tiles = pl.cdiv(total_units, max_units)
        if total_units >= 2 and n_tiles % 2 == 1:
            # Even tile count -> balanced split across v7x's two TensorCores.
            n_tiles = min(n_tiles + 1, total_units)
        units_per_tile = pl.cdiv(total_units, n_tiles)
        tile_cols = units_per_tile * _LANE
        n_tiles = pl.cdiv(total_units, units_per_tile)
        # Last block may be partial (n not a multiple of 128): masked store,
        # no host-side pad / slice round trips.

    kernel = functools.partial(_crosstalk_kernel, batch=B)
    strength_arr = jnp.asarray(jnp.reshape(jnp.asarray(strength, jnp.float32), (1,)))

    block = (B, tile_cols)
    out2d = pl.pallas_call(
        kernel,
        out_shape=jax.ShapeDtypeStruct((B, n), dtype),
        grid=(n_tiles,),
        in_specs=[
            pl.BlockSpec(memory_space=pltpu.MemorySpace.SMEM),   # strength scalar
            pl.BlockSpec(block, lambda t: (0, t)),               # x slab
        ],
        out_specs=pl.BlockSpec(block, lambda t: (0, t)),
        compiler_params=pltpu.CompilerParams(
            # Every output block is written exactly once -> fully parallel;
            # lets v7x shard the column tiles across its two TensorCores.
            dimension_semantics=("parallel",),
            vmem_limit_bytes=_VMEM_LIMIT_BYTES,
        ),
    )(strength_arr, x2d)

    return out2d.reshape(B, C, H, W)


if __name__ == "__main__":
    key = jax.random.PRNGKey(0)
    k1, k2, k3 = jax.random.split(key, 3)
    strength = 0.2

    # 1) Small aligned case (B=2, n=1024): force the Pallas path.
    x1 = jax.random.normal(k1, (2, 4, 16, 16), dtype=jnp.float32)
    out1 = jax.block_until_ready(
        cross_talk(x1, strength, training=True, xla_fallback_bytes=0))
    ref1 = x1 + jnp.roll(x1, 1, axis=0) * strength
    assert out1.shape == x1.shape and out1.dtype == x1.dtype
    assert jnp.allclose(out1, ref1, atol=1e-6, rtol=1e-6), "mismatch (aligned)"

    # 2) Unaligned pixel count (n = 3*17*19 = 969) and odd batch (B=3):
    #    exercises the partial (masked) last block and the in-kernel roll.
    x2 = jax.random.normal(k2, (3, 3, 17, 19), dtype=jnp.float32)
    out2 = jax.block_until_ready(
        cross_talk(x2, strength, training=True, xla_fallback_bytes=0))
    ref2 = x2 + jnp.roll(x2, 1, axis=0) * strength
    assert jnp.allclose(out2, ref2, atol=1e-6, rtol=1e-6), "mismatch (unaligned)"

    # 3) B=1 degenerates to x * (1 + strength).
    x3 = jax.random.normal(k3, (1, 4, 8, 16), dtype=jnp.float32)
    out3 = jax.block_until_ready(
        cross_talk(x3, strength, training=True, xla_fallback_bytes=0))
    assert jnp.allclose(out3, x3 * (1.0 + strength), atol=1e-6, rtol=1e-6)

    # 4) Eval mode and zero strength are the identity.
    assert jnp.array_equal(cross_talk(x1, strength, training=False), x1)
    assert jnp.array_equal(cross_talk(x1, 0.0, training=True), x1)

    # 5) Default small-input XLA fallback path is also correct.
    out_fb = jax.block_until_ready(cross_talk(x1, strength, training=True))
    assert jnp.allclose(out_fb, ref1, atol=1e-6, rtol=1e-6)

    print("KERNEL_OK")
</pallas_src>

<mosaic_0001>
module attributes {stable_mosaic.version = 11 : i64} {
  func.func @_crosstalk_kernel(%arg0: i32, %arg1: memref<1xf32, #tpu.memory_space<smem>>, %arg2: memref<2x512xf32, #tpu.memory_space<vmem>>, %arg3: memref<2x512xf32, #tpu.memory_space<vmem>>) attributes {dimension_semantics = [#tpu.dimension_semantics<parallel>], iteration_bounds = array<i64: 2>, scalar_prefetch = 0 : i64, scratch_operands = 0 : i64, tpu.core_type = #tpu.core_type<tc>, window_params = [{transform_indices = @transform_0, window_bounds = array<i64: 1>}, {transform_indices = @transform_1, window_bounds = array<i64: 2, 512>}, {transform_indices = @transform_2, window_bounds = array<i64: 2, 512>}]} {
    %c0 = arith.constant 0 : index
    %c0_0 = arith.constant 0 : index
    %0 = vector.load %arg2[%c0, %c0_0] : memref<2x512xf32, #tpu.memory_space<vmem>>, vector<2x512xf32>
    %c0_1 = arith.constant 0 : index
    %1 = memref.load %arg1[%c0_1] : memref<1xf32, #tpu.memory_space<smem>>
    %2 = vector.extract_strided_slice %0 {offsets = [1, 0], sizes = [1, 512], strides = [1, 1]} : vector<2x512xf32> to vector<1x512xf32>
    %3 = vector.extract_strided_slice %0 {offsets = [0, 0], sizes = [1, 512], strides = [1, 1]} : vector<2x512xf32> to vector<1x512xf32>
    %4 = tpu.concatenate %2, %3 in 0 : vector<1x512xf32>, vector<1x512xf32> -> vector<2x512xf32>
    %5 = vector.broadcast %1 : f32 to vector<2x512xf32>
    %6 = arith.mulf %4, %5 : vector<2x512xf32>
    %7 = arith.addf %0, %6 : vector<2x512xf32>
    %c0_2 = arith.constant 0 : index
    %c0_3 = arith.constant 0 : index
    %8 = vector.load %arg3[%c0_2, %c0_3] : memref<2x512xf32, #tpu.memory_space<vmem>>, vector<2x512xf32>
    tpu.vector_store %arg3[%c0_2, %c0_3], %7 {strides = array<i32>} : memref<2x512xf32, #tpu.memory_space<vmem>>, vector<2x512xf32>,
    return
  }
  func.func @transform_0(%arg0: i32) -> i32 {
    %c0_i32 = arith.constant 0 : i32
    %c0_i32_0 = arith.constant 0 : i32
    return %c0_i32 : i32
  }
  func.func @transform_1(%arg0: i32) -> (i32, i32) {
    %c0_i32 = arith.constant 0 : i32
    %c0_i32_0 = arith.constant 0 : i32
    return %c0_i32, %arg0 : i32, i32
  }
  func.func @transform_2(%arg0: i32) -> (i32, i32) {
    %c0_i32 = arith.constant 0 : i32
    %c0_i32_0 = arith.constant 0 : i32
    return %c0_i32, %arg0 : i32, i32
  }
}

</mosaic_0001>

<bundles_post_ra>
// kernel: tpu_custom_call.1
= control target key start
LH: loop header
LB: loop body
LE: loop exit
PB: predicated region body
PF: predicated region fallthrough
CT: control target
= control target key end

     0   :  { %s648_s0 = inlined_call_operand.<no memory space> [shape: f32[1], index: 0, kind: input, shape index: {}]   ;;  %s649_s1 = inlined_call_operand.hbm [shape: f32[2,1024], index: 1, kind: input, shape index: {}]   ;;  %s650_s2 = inlined_call_operand.hbm [shape: f32[2,1024], index: 2, kind: output, shape index: {}]  }
   0x1   :  { %7 = sst [smem:[#allocation2]] %s648_s0 }
   0x2   :  { %8 = vsyncpa [#allocation4], 0 }
   0x3   :  { %10 = vsyncpa [#allocation4 + $0x1], 0 }
   0x4   :  { %11 = vsyncpa [#allocation5], 0 }
   0x5   :  { %13 = vsyncpa [#allocation5 + $0x1], 0  ;;  %s503_s11 = smov 0   ;;  %s505_s12 = smov 0  }
   0x6   :  { %s507_s13 = smov 0   ;;  %s509_s14 = smov 0  }
   0x7 LB: > { %s524_s0 = sadd.s32 4294967295, %s480_s14   ;;  %s325_s15 = sadd.s32 4294967294, %s480_s14   ;;  %s480_s14 = sphi %s509_s14, %s667_s14   ;;  %s476_s13 = sphi %s507_s13, %s666_s13   ;;  %s472_s12 = sphi %s505_s12, %s665_s12   ;;  %s468_s11 = sphi %s503_s11, %s664_s11  }
   0x8   : > { %s528_s16 = sadd.s32 1, %s480_s14   ;;  %s47_s17 = sadd.s32 1, %s476_s13 }
   0x9   : > { %s44_s18 = ssub.s32 %s480_s14, %s528_s16  ;;  %p54_p0 = scmp.ne.s32.totalorder %s476_s13, %s472_s12 }
   0xa   : > { %p45_p1 = scmp.eq.s32.totalorder %s44_s18, 0  ;;  %p55_p2 = scmp.eq.s32.totalorder %s480_s14, 0 }
   0xb   : > { %p60_p3 = scmp.ne.s32.totalorder %s472_s12, %s468_s11  ;;  %p61_p4 = scmp.eq.s32.totalorder %s524_s0, 0 }
   0xc   : > { %s540_s19 = scalar_select %p45_p1, %s476_s13, %s47_s17  }
   0xd   : > { %p542_p5 = por %p55_p2, %p54_p0  ;;  %p546_p6 = por %p61_p4, %p60_p3 }
   0xe   : > { %p84_p7 = scmp.eq.s32.totalorder %s524_s0, 1  ;;  %p90_p8 = scmp.eq.s32.totalorder %s325_s15, 1 }
   0xf   : > { %s654_s21 = scalar_select %p546_p6, 1, 0 }
  0x10   : > { %p353_p10 = scmp.lt.s32.totalorder %s480_s14, 2  ;;  %p553_p11 = por %p84_p7, %p54_p0 }
  0x11   : > { %p557_p12 = por %p90_p8, %p60_p3  ;;  %s113_s24 = sand.u32 1, %s476_s13  }
  0x12   : > { %s655_s22 = scalar_select %p553_p11, 1, 0 }
  0x13   : > { %s656_s23 = scalar_select %p557_p12, 1, 0 }
  0x14   : > { %s339_s25 = sshll.u32 %s480_s14, 7  ;;  %s328_s26 = sshll.u32 %s113_s24, 3 }
  0x15   : > { %s566_s29 = scalar_lea.hbm %s649_s1, %s339_s25  ;;  %s117_s30 = scalar_lea.vmem [#allocation3], %s328_s26 }
  0x16   : > { %s125_s3 = sshll.u32 %s117_s30, 4  ;;  %p570_p13 = pnand %p353_p10, %p542_p5  ;;  %s574_s3 = int_to_ptr.vmem [resolvable:$true] %s125_s3 }
  0x17   : > { %s114_s5 = scalar_lea.sflag [#allocation4], %s113_s24  ;;  %s388_s6 = scalar_lea.hbm %s566_s29, 128 }
  0x18   : > { %p389_p2 = scmp.ne.s32.totalorder %s566_s29, %s388_s6  ;;  %p390_p3 = pneg %p570_p13 }
  0x19   : > { %s393_s9 = scalar_lea.hbm %s649_s1, 256  ;;  %p394_p5 = scmp.lt.s32.totalorder %s566_s29, %s649_s1 }
  0x1a   : > { %p391_p4 = pnand %p390_p3, %p389_p2  ;;  %p395_p8 = scmp.lt.s32.totalorder %s393_s9, %s388_s6 }
  0x1c   : > { %p392_p7 = pneg %p391_p4  ;;  %p396_p10 = por %p395_p8, %p394_p5 }
  0x1e   : > { %p397_p9 = pnand %p396_p10, %p392_p7 }
  0x20   : > { %400 = shalt.err (!%p397_p9)
}
  0x21   : > { %s401_s17 = scalar_lea.vmem %s574_s3, 128  ;;  %s482_s18 = smov [#allocation3]  }
  0x22   : > { %p402_p0 = scmp.ne.s32.totalorder %s574_s3, %s401_s17  ;;  %s406_s20 = sshll.u32 %s482_s18, 4  ;;  %s407_s20 = int_to_ptr.vmem [resolvable:$false] %s406_s20 }
  0x23   : > { %s408_s24 = scalar_lea.vmem %s407_s20, 256  ;;  %p409_p4 = scmp.lt.s32.totalorder %s574_s3, %s407_s20 }
  0x24   : > { %p404_p1 = pnand %p402_p0, %p390_p3  ;;  %p410_p12 = scmp.lt.s32.totalorder %s408_s24, %s401_s17 }
  0x26   : > { %p405_p2 = pneg %p404_p1  ;;  %p411_p11 = por %p410_p12, %p409_p4 }
  0x28   : > { %p412_p6 = pnand %p411_p11, %p405_p2 }
  0x2a   : > { %415 = shalt.err (!%p412_p6)
}
  0x2b   : > { %348 = dma.hbm_to_vmem [thread:$0]  (!%p570_p13), %s566_s29, 128, %s574_s3, %s114_s5  }
  0x2c   : > { %p658_p9 = scmp.lt.s32.totalorder %s480_s14, 3  ;;  %p659_p7 = scmp.ge.s32.totalorder %s480_s14, 1 }
  0x2e   : > { %p131_p0 = pnand %p659_p7, %p658_p9 }
  0x2f   : > { %s601_s25 = sand.u32 (!%p131_p0), 1, %s472_s12   ;;  %p660_p6 = scmp.ne.s32.totalorder (!%p131_p0), %s654_s21, 0 }
  0x30   : > { %134 = sbr.rel (%p131_p0) target bundleno = 88 (0x58), region = 28  ;;  %s332_s26 = sshll.u32 (!%p131_p0), %s601_s25, 3 }
  0x31   : > { %s137_s27 = scalar_lea.sflag (!%p131_p0), [#allocation4], %s601_s25  ;;  %s140_s28 = scalar_lea.vmem (!%p131_p0), [#allocation3], %s332_s26 }
  0x35   : > { %459 = dma.done.wait (%p660_p6), %s137_s27, 128  }
  0x36   : > { %461 = vsyncadd (%p660_p6), %s137_s27, 4294967168  ;;  %v166_v0 = vlaneseq  ;;  %s164_s29 = sld [smem:[#allocation2]]  ;;  %v483_v2 = vmov 1983009808   ;;  %v163_v13 = vld [vmem:[%s140_s28] sm:$0xff]  ;;  %vm206_vm0 = vcmask 1040384  }
  0x37   : > { %v223_v3 = vunpack.c.l.s4 %v483_v2  ;;  %s160_s21 = scalar_lea.vmem [#allocation6], %s332_s26  ;;  %s340_s3 = sshll.u32 %s524_s0, 7 }
  0x38   : > { %v167_v1 = vshrl.u32 %v166_v0, 7  ;;  %s255_s30 = sshll.u32 %s160_s21, 4  ;;  %s253_s6 = scalar_lea.hbm %s650_s2, %s340_s3  ;;  %s256_s30 = int_to_ptr.vmem [resolvable:$true] %s255_s30 }
  0x39   : > { %v224_v12 = vunpack.c.0.s8 %v223_v3  ;;  %s241_s7 = scalar_lea.sflag [#allocation5], %s601_s25  ;;  %s416_s8 = scalar_lea.vmem %s256_s30, 128 }
  0x3a   : > { %v168_v4 = vsub.s32 1, %v167_v1  ;;  %v172_v5 = vsub.s32 3, %v167_v1  ;;  %v176_v6 = vsub.s32 5, %v167_v1  ;;  %v180_v7 = vsub.s32 7, %v167_v1  ;;  %p417_p11 = scmp.ne.s32.totalorder %s256_s30, %s416_s8  ;;  %p661_p12 = scmp.ne.s32.totalorder %s655_s22, 0 }
  0x3b   : > { %v188_v8 = vsub.s32 0, %v167_v1  ;;  %v192_v9 = vsub.s32 2, %v167_v1  ;;  %v196_v10 = vsub.s32 4, %v167_v1  ;;  %v200_v11 = vsub.s32 6, %v167_v1  ;;  %s484_s9 = smov [#allocation6]  }
  0x3c   : > { %v211_v14 = vstv %s164_s29  ;;  %v169_v15 = vrot.slane %v163_v13, %v168_v4  ;;  %v173_v16 = vrot.slane %v163_v13, %v172_v5  ;;  %v177_v17 = vrot.slane %v163_v13, %v176_v6  ;;  %p418_p13 = pnand %p417_p11, %p661_p12  ;;  %s420_s10 = sshll.u32 %s484_s9, 4  ;;  %s421_s10 = int_to_ptr.vmem [resolvable:$false] %s420_s10 }
  0x3d   : > { %v181_v18 = vrot.slane %v163_v13, %v180_v7  ;;  %v189_v19 = vrot.slane %v163_v13, %v188_v8  ;;  %v193_v20 = vrot.slane %v163_v13, %v192_v9  ;;  %v197_v21 = vrot.slane %v163_v13, %v196_v10  ;;  %s422_s15 = scalar_lea.vmem %s421_s10, 256  ;;  %p423_p3 = scmp.lt.s32.totalorder %s256_s30, %s421_s10 }
  0x3e   : > { %v201_v22 = vrot.slane %v163_v13, %v200_v11  ;;  %v227_v23 = vsub.s32 %v224_v12, %v167_v1  ;;  %p419_p1 = pneg %p418_p13  ;;  %p424_p5 = scmp.lt.s32.totalorder %s422_s15, %s416_s8 }
  0x3f   : > { %v207_v24 = vsel %vm206_vm0, %v169_v15, %v189_v19  ;;  %v208_v25 = vsel %vm206_vm0, %v173_v16, %v193_v20  ;;  %v209_v26 = vsel %vm206_vm0, %v177_v17, %v197_v21 }
  0x40   : > { %v210_v27 = vsel %vm206_vm0, %v181_v18, %v201_v22  ;;  %v212_v28 = vmul.f32 %v211_v14, %v207_v24  ;;  %v213_v29 = vmul.f32 %v211_v14, %v208_v25  ;;  %v214_v30 = vmul.f32 %v211_v14, %v209_v26  ;;  %p425_p8 = por %p424_p5, %p423_p3 }
  0x41   : > { %v215_v31 = vmul.f32 %v211_v14, %v210_v27 }
  0x42   : > { %v220_v32 = vcombine.low %v212_v28, %v213_v29  ;;  %p426_p10 = pnand %p425_p8, %p419_p1 }
  0x43   : > { %v221_v33 = vcombine.low %v214_v30, %v215_v31 }
  0x44   : > { %v228_v34 = vrot.slane %v220_v32, %v227_v23 }
  0x45   : > { %v235_v35 = vrot.slane %v221_v33, %v227_v23 }
  0x47   : > { %v236_v36 = vcombine.low %v228_v34, %v235_v35 }
  0x49   : > { %v238_v37 = vadd.f32 %v236_v36, %v163_v13 }
  0x4b   : > { %239 = vst [vmem:[%s160_s21] sm:$0xff] %v238_v37 }
  0x4c   : > { %429 = shalt.err (!%p426_p10)
}
  0x4d   : > { %s430_s0 = scalar_lea.hbm %s253_s6, 128  ;;  %s434_s20 = scalar_lea.hbm %s650_s2, 256 }
  0x4e   : > { %p431_p2 = scmp.ne.s32.totalorder %s253_s6, %s430_s0  ;;  %p435_p7 = scmp.lt.s32.totalorder %s253_s6, %s650_s2 }
  0x4f   : > { %p436_p0 = scmp.lt.s32.totalorder %s434_s20, %s430_s0 }
  0x50   : > { %p432_p4 = pnand %p431_p2, %p661_p12 }
  0x51   : > { %p437_p6 = por %p436_p0, %p435_p7 }
  0x52   : > { %p433_p9 = pneg %p432_p4 }
  0x54   : > { %p438_p11 = pnand %p437_p6, %p433_p9 }
  0x56   : > { %441 = shalt.err (!%p438_p11)
}
  0x57   : > { %343 = dma.vmem_to_hbm [thread:$0]  (%p661_p12), %s256_s30, 128, %s253_s6, %s241_s7  }
  0x58 PF: > { %s267_s26 = sand.u32 1, %s468_s11   ;;  %p662_p13 = scmp.ne.s32.totalorder %s656_s23, 0 }
  0x59   : > { %p663_p1 = scmp.ge.s32.totalorder %s480_s14, 2  ;;  %s268_s27 = scalar_lea.sflag [#allocation5], %s267_s26 }
  0x5b   : > { %p350_p3 = pnand %p663_p1, %p662_p13 }
  0x5d   : > { %p351_p5 = pneg %p350_p3 }
  0x5f   : > { %463 = dma.done.wait (%p351_p5), %s268_s27, 128  }
  0x60   : > { %465 = vsyncadd (%p351_p5), %s268_s27, 4294967168  ;;  %p16_p8 = scmp.ge.s32.totalorder %s528_s16, 4   ;;  %s664_s11 = smov %s472_s12 }
  0x61   : > { %s665_s12 = smov %s476_s13  ;;  %s666_s13 = smov %s540_s19 }
  0x62   : > { %s667_s14 = smov %s528_s16  ;;  %18 = sbr.rel (!%p16_p8) target bundleno = 7 (0x7), region = 73 }
  0x67   :  { %273 = vsyncpa [#allocation4], 1 }
  0x68   :  { %275 = vsyncpa [#allocation4 + $0x1], 1 }
  0x69   :  { %276 = vsyncpa [#allocation5], 1 }
  0x6a   :  { %278 = vsyncpa [#allocation5 + $0x1], 1 }

</bundles_post_ra>
